<compile_context>
chip_gen: v6e
topology: v6e:2x2x1
jax: 0.10.0
libtpu: 0.0.40
codegen_flags: <defaults>
</compile_context>

<pallas_src>
import functools
import math

import jax
import jax.numpy as jnp
from jax.experimental import pallas as pl
from jax.experimental.pallas import tpu as pltpu

EPS = 1e-5
LANES = 128


def _round_up(a, b):
    return (a + b - 1) // b * b


# ---------------- Phase 1: conv (im2col matmul) + bias + BN statistics ----------------
def _conv_stats_kernel(p_ref, w_ref, b_ref, g_ref, bt_ref,
                       y_ref, stats_ref, sum_sc, ssq_sc, *, tm, m_actual):
    i = pl.program_id(0)

    @pl.when(i == 0)
    def _():
        sum_sc[...] = jnp.zeros_like(sum_sc)
        ssq_sc[...] = jnp.zeros_like(ssq_sc)

    # Conv2d as an im2col matmul (one K block: K is tiny, kernel is bandwidth-bound).
    y = jnp.dot(p_ref[...], w_ref[...], preferred_element_type=jnp.float32)
    y = y + b_ref[...]
    y_ref[...] = y

    # Mask any padded rows beyond the true M so they do not pollute the BN statistics.
    rows = i * tm + jax.lax.broadcasted_iota(jnp.int32, (tm, 1), 0)
    ym = jnp.where(rows < m_actual, y, 0.0)
    sum_sc[...] += jnp.sum(ym, axis=0, keepdims=True)
    ssq_sc[...] += jnp.sum(ym * ym, axis=0, keepdims=True)

    @pl.when(i == pl.num_programs(0) - 1)
    def _():
        inv_m = 1.0 / m_actual
        mean = sum_sc[...] * inv_m
        var = jnp.maximum(ssq_sc[...] * inv_m - mean * mean, 0.0)   # biased variance
        scale = g_ref[...] * jax.lax.rsqrt(var + EPS)               # gamma / sqrt(var+eps)
        shift = bt_ref[...] - mean * scale                          # folded BN affine
        stats_ref[...] = jnp.concatenate([scale, shift], axis=0)    # (2, Cp)


# ---------------- Phase 2: apply folded BN affine (single FMA per element) -------------
def _bn_apply_kernel(y_ref, stats_ref, o_ref):
    o_ref[...] = y_ref[...] * stats_ref[0:1, :] + stats_ref[1:2, :]


def downsample(x, w, b, gamma, beta):
    """Conv2d(Cin, Cout, 3, stride=2, padding=1) + BatchNorm2d (training stats), fused.

    x: (N, Cin, H, W) float32 NCHW.  Returns (N, Cout, Ho, Wo) float32 NCHW.
    """
    N, Cin, H, W = x.shape
    Cout = w.shape[0]
    KH = KW = 3
    S = 2
    Ho = (H + 2 - KH) // S + 1
    Wo = (W + 2 - KW) // S + 1
    M = N * Ho * Wo
    K = Cin * KH * KW

    # --- wrapper glue: NHWC im2col (channel-last => contiguous reshape, no big relayout) ---
    x_nhwc = jnp.transpose(x, (0, 2, 3, 1)).astype(jnp.float32)
    xp = jnp.pad(x_nhwc, ((0, 0), (1, 1), (1, 1), (0, 0)))
    cols = []
    for kh in range(KH):
        for kw in range(KW):
            cols.append(xp[:, kh:kh + S * (Ho - 1) + 1:S,
                           kw:kw + S * (Wo - 1) + 1:S, :])           # (N, Ho, Wo, Cin)
    patches = jnp.concatenate(cols, axis=-1).reshape(M, K)           # K order: (kh, kw, cin)

    # Weight in (kh, kw, cin, cout) order to match the patch K ordering; pad Cout to 128
    # lanes so the output tiles are lane-dense (full-width stores).
    Cp = _round_up(Cout, LANES)
    w2 = jnp.transpose(w, (2, 3, 1, 0)).reshape(K, Cout).astype(jnp.float32)
    w2 = jnp.pad(w2, ((0, 0), (0, Cp - Cout)))
    b2 = jnp.pad(b.reshape(1, Cout).astype(jnp.float32), ((0, 0), (0, Cp - Cout)))
    g2 = jnp.pad(gamma.reshape(1, Cout).astype(jnp.float32), ((0, 0), (0, Cp - Cout)))
    bt2 = jnp.pad(beta.reshape(1, Cout).astype(jnp.float32), ((0, 0), (0, Cp - Cout)))

    # --- tiling over M: TM*Cp*4 B per buffered tile — comfortably inside v7x's 64 MiB VMEM.
    TM = min(512, _round_up(M, 8))
    M_pad = _round_up(M, TM)
    if M_pad != M:
        patches = jnp.pad(patches, ((0, M_pad - M), (0, 0)))
    n_tiles = M_pad // TM

    kernel1 = functools.partial(_conv_stats_kernel, tm=TM, m_actual=M)

    y, stats = pl.pallas_call(
        kernel1,
        out_shape=(jax.ShapeDtypeStruct((M_pad, Cp), jnp.float32),
                   jax.ShapeDtypeStruct((2, Cp), jnp.float32)),
        grid=(n_tiles,),
        in_specs=[
            pl.BlockSpec((TM, K), lambda i: (i, 0)),
            pl.BlockSpec((K, Cp), lambda i: (0, 0)),
            pl.BlockSpec((1, Cp), lambda i: (0, 0)),
            pl.BlockSpec((1, Cp), lambda i: (0, 0)),
            pl.BlockSpec((1, Cp), lambda i: (0, 0)),
        ],
        out_specs=(
            pl.BlockSpec((TM, Cp), lambda i: (i, 0)),
            pl.BlockSpec((2, Cp), lambda i: (0, 0)),
        ),
        scratch_shapes=[pltpu.VMEM((1, Cp), jnp.float32),
                        pltpu.VMEM((1, Cp), jnp.float32)],
        compiler_params=pltpu.CompilerParams(
            dimension_semantics=("arbitrary",)),      # M axis carries the BN accumulator
    )(patches, w2, b2, g2, bt2)

    out = pl.pallas_call(
        _bn_apply_kernel,
        out_shape=jax.ShapeDtypeStruct((M_pad, Cp), jnp.float32),
        grid=(n_tiles,),
        in_specs=[
            pl.BlockSpec((TM, Cp), lambda i: (i, 0)),
            pl.BlockSpec((2, Cp), lambda i: (0, 0)),
        ],
        out_specs=pl.BlockSpec((TM, Cp), lambda i: (i, 0)),
        input_output_aliases={0: 0},                  # normalize y in place
        compiler_params=pltpu.CompilerParams(
            dimension_semantics=("parallel",)),       # lets both v7x TensorCores work
    )(y, stats)

    out = out[:M, :Cout].reshape(N, Ho, Wo, Cout)
    return jnp.transpose(out, (0, 3, 1, 2))


def reference(x, w, b, gamma, beta):
    """Pure-JAX reference matching PyTorch Conv2d + BatchNorm2d (training mode)."""
    y = jax.lax.conv_general_dilated(
        x, w, window_strides=(2, 2), padding=((1, 1), (1, 1)),
        dimension_numbers=('NCHW', 'OIHW', 'NCHW'))
    y = y + b.reshape(1, -1, 1, 1)
    mean = jnp.mean(y, axis=(0, 2, 3), keepdims=True)
    var = jnp.mean((y - mean) ** 2, axis=(0, 2, 3), keepdims=True)
    y = (y - mean) / jnp.sqrt(var + EPS)
    return y * gamma.reshape(1, -1, 1, 1) + beta.reshape(1, -1, 1, 1)


if __name__ == "__main__":
    # Small shapes consistent with the module: in_dim=3, out_dim=32, 16x16 spatial.
    N, Cin, H, W = 2, 3, 16, 16
    Cout = 32

    key = jax.random.PRNGKey(0)
    kx, kw, kb = jax.random.split(key, 3)

    x = jax.random.normal(kx, (N, Cin, H, W), dtype=jnp.float32)

    # Deterministic parameter init (PyTorch-style uniform bounds for Conv2d).
    fan_in = Cin * 3 * 3
    bound = 1.0 / math.sqrt(fan_in)
    w = jax.random.uniform(kw, (Cout, Cin, 3, 3), jnp.float32, -bound, bound)
    b = jax.random.uniform(kb, (Cout,), jnp.float32, -bound, bound)
    gamma = jnp.ones((Cout,), jnp.float32)   # BatchNorm2d default weight
    beta = jnp.zeros((Cout,), jnp.float32)   # BatchNorm2d default bias

    out = downsample(x, w, b, gamma, beta)
    out = jax.block_until_ready(out)

    ref = reference(x, w, b, gamma, beta)
    assert out.shape == (N, Cout, 8, 8), out.shape
    assert jnp.allclose(out, ref, atol=1e-4, rtol=1e-4), float(jnp.max(jnp.abs(out - ref)))

    print("KERNEL_OK")
</pallas_src>

<mosaic_0001>
module attributes {stable_mosaic.version = 11 : i64} {
  func.func @_conv_stats_kernel(%arg0: i32, %arg1: memref<128x27xf32, #tpu.memory_space<vmem>>, %arg2: memref<27x128xf32, #tpu.memory_space<vmem>>, %arg3: memref<1x128xf32, #tpu.memory_space<vmem>>, %arg4: memref<1x128xf32, #tpu.memory_space<vmem>>, %arg5: memref<1x128xf32, #tpu.memory_space<vmem>>, %arg6: memref<128x128xf32, #tpu.memory_space<vmem>>, %arg7: memref<2x128xf32, #tpu.memory_space<vmem>>, %arg8: memref<1x128xf32, #tpu.memory_space<vmem>>, %arg9: memref<1x128xf32, #tpu.memory_space<vmem>>) attributes {dimension_semantics = [#tpu.dimension_semantics<arbitrary>], iteration_bounds = array<i64: 1>, scalar_prefetch = 0 : i64, scratch_operands = 2 : i64, tpu.core_type = #tpu.core_type<tc>, window_params = [{transform_indices = @transform_0, window_bounds = array<i64: 128, 27>}, {pipeline_mode = #tpu.pipeline_mode<synchronous>, transform_indices = @transform_1, window_bounds = array<i64: 27, 128>}, {pipeline_mode = #tpu.pipeline_mode<synchronous>, transform_indices = @transform_2, window_bounds = array<i64: 1, 128>}, {pipeline_mode = #tpu.pipeline_mode<synchronous>, transform_indices = @transform_3, window_bounds = array<i64: 1, 128>}, {pipeline_mode = #tpu.pipeline_mode<synchronous>, transform_indices = @transform_4, window_bounds = array<i64: 1, 128>}, {transform_indices = @transform_5, window_bounds = array<i64: 128, 128>}, {pipeline_mode = #tpu.pipeline_mode<synchronous>, transform_indices = @transform_6, window_bounds = array<i64: 2, 128>}]} {
    %c0_i32 = arith.constant 0 : i32
    %0 = arith.cmpi eq, %arg0, %c0_i32 : i32
    %1 = arith.extui %0 : i1 to i32
    %c0_i32_0 = arith.constant 0 : i32
    %2 = arith.cmpi ne, %1, %c0_i32_0 : i32
    scf.if %2 {
      %cst_22 = arith.constant 0.000000e+00 : f32
      %34 = vector.broadcast %cst_22 : f32 to vector<1x128xf32>
      %c0_23 = arith.constant 0 : index
      %c0_24 = arith.constant 0 : index
      %35 = vector.load %arg8[%c0_23, %c0_24] : memref<1x128xf32, #tpu.memory_space<vmem>>, vector<1x128xf32>
      tpu.vector_store %arg8[%c0_23, %c0_24], %34 {strides = array<i32>} : memref<1x128xf32, #tpu.memory_space<vmem>>, vector<1x128xf32>,
      %cst_25 = arith.constant 0.000000e+00 : f32
      %36 = vector.broadcast %cst_25 : f32 to vector<1x128xf32>
      %c0_26 = arith.constant 0 : index
      %c0_27 = arith.constant 0 : index
      %37 = vector.load %arg9[%c0_26, %c0_27] : memref<1x128xf32, #tpu.memory_space<vmem>>, vector<1x128xf32>
      tpu.vector_store %arg9[%c0_26, %c0_27], %36 {strides = array<i32>} : memref<1x128xf32, #tpu.memory_space<vmem>>, vector<1x128xf32>,
    } else {
    }
    %c0 = arith.constant 0 : index
    %c0_1 = arith.constant 0 : index
    %3 = vector.load %arg1[%c0, %c0_1] : memref<128x27xf32, #tpu.memory_space<vmem>>, vector<128x27xf32>
    %c0_2 = arith.constant 0 : index
    %c0_3 = arith.constant 0 : index
    %4 = vector.load %arg2[%c0_2, %c0_3] : memref<27x128xf32, #tpu.memory_space<vmem>>, vector<27x128xf32>
    %cst = arith.constant dense<0.000000e+00> : vector<128x128xf32>
    %5 = tpu.matmul %3, %4, %cst {dimension_numbers = #tpu.dot_dimension_numbers<[1], [0], [0], [1], [0, 0, 1, 1], [], []>} : vector<128x27xf32>, vector<27x128xf32>, vector<128x128xf32> -> vector<128x128xf32>
    %c0_4 = arith.constant 0 : index
    %c0_5 = arith.constant 0 : index
    %6 = vector.load %arg3[%c0_4, %c0_5] : memref<1x128xf32, #tpu.memory_space<vmem>>, vector<1x128xf32>
    %7 = vector.broadcast %6 : vector<1x128xf32> to vector<128x128xf32>
    %8 = arith.addf %5, %7 : vector<128x128xf32>
    %c0_6 = arith.constant 0 : index
    %c0_7 = arith.constant 0 : index
    %9 = vector.load %arg6[%c0_6, %c0_7] : memref<128x128xf32, #tpu.memory_space<vmem>>, vector<128x128xf32>
    tpu.vector_store %arg6[%c0_6, %c0_7], %8 {strides = array<i32>} : memref<128x128xf32, #tpu.memory_space<vmem>>, vector<128x128xf32>,
    %c128_i32 = arith.constant 128 : i32
    %10 = arith.muli %arg0, %c128_i32 : i32
    %11 = tpu.iota {dimensions = array<i32: 0>} : vector<128x1xi32>
    %12 = vector.broadcast %10 : i32 to vector<128x1xi32>
    %13 = arith.addi %12, %11 : vector<128x1xi32>
    %c128_i32_8 = arith.constant 128 : i32
    %14 = vector.broadcast %c128_i32_8 : i32 to vector<128x1xi32>
    %15 = arith.cmpi slt, %13, %14 : vector<128x1xi32>
    %cst_9 = arith.constant 0.000000e+00 : f32
    %16 = vector.shape_cast %15 : vector<128x1xi1> to vector<128x1xi1>
    %17 = vector.broadcast %16 : vector<128x1xi1> to vector<128x128xi1>
    %18 = vector.broadcast %cst_9 : f32 to vector<128x128xf32>
    %19 = arith.select %17, %8, %18 : vector<128x128xi1>, vector<128x128xf32>
    %c0_10 = arith.constant 0 : index
    %c0_11 = arith.constant 0 : index
    %20 = vector.load %arg8[%c0_10, %c0_11] : memref<1x128xf32, #tpu.memory_space<vmem>>, vector<1x128xf32>
    %cst_12 = arith.constant dense<0.000000e+00> : vector<128xf32>
    %21 = vector.multi_reduction <add>, %19, %cst_12 [0] : vector<128x128xf32> to vector<128xf32>
    %22 = vector.shape_cast %21 : vector<128xf32> to vector<1x128xf32>
    %23 = arith.addf %20, %22 : vector<1x128xf32>
    %c0_13 = arith.constant 0 : index
    %c0_14 = arith.constant 0 : index
    %24 = vector.load %arg8[%c0_13, %c0_14] : memref<1x128xf32, #tpu.memory_space<vmem>>, vector<1x128xf32>
    tpu.vector_store %arg8[%c0_13, %c0_14], %23 {strides = array<i32>} : memref<1x128xf32, #tpu.memory_space<vmem>>, vector<1x128xf32>,
    %c0_15 = arith.constant 0 : index
    %c0_16 = arith.constant 0 : index
    %25 = vector.load %arg9[%c0_15, %c0_16] : memref<1x128xf32, #tpu.memory_space<vmem>>, vector<1x128xf32>
    %26 = arith.mulf %19, %19 : vector<128x128xf32>
    %cst_17 = arith.constant dense<0.000000e+00> : vector<128xf32>
    %27 = vector.multi_reduction <add>, %26, %cst_17 [0] : vector<128x128xf32> to vector<128xf32>
    %28 = vector.shape_cast %27 : vector<128xf32> to vector<1x128xf32>
    %29 = arith.addf %25, %28 : vector<1x128xf32>
    %c0_18 = arith.constant 0 : index
    %c0_19 = arith.constant 0 : index
    %30 = vector.load %arg9[%c0_18, %c0_19] : memref<1x128xf32, #tpu.memory_space<vmem>>, vector<1x128xf32>
    tpu.vector_store %arg9[%c0_18, %c0_19], %29 {strides = array<i32>} : memref<1x128xf32, #tpu.memory_space<vmem>>, vector<1x128xf32>,
    %c0_i32_20 = arith.constant 0 : i32
    %31 = arith.cmpi eq, %arg0, %c0_i32_20 : i32
    %32 = arith.extui %31 : i1 to i32
    %c0_i32_21 = arith.constant 0 : i32
    %33 = arith.cmpi ne, %32, %c0_i32_21 : i32
    scf.if %33 {
      %c0_22 = arith.constant 0 : index
      %c0_23 = arith.constant 0 : index
      %34 = vector.load %arg8[%c0_22, %c0_23] : memref<1x128xf32, #tpu.memory_space<vmem>>, vector<1x128xf32>
      %cst_24 = arith.constant 7.812500e-03 : f32
      %35 = vector.broadcast %cst_24 : f32 to vector<1x128xf32>
      %36 = arith.mulf %34, %35 : vector<1x128xf32>
      %c0_25 = arith.constant 0 : index
      %c0_26 = arith.constant 0 : index
      %37 = vector.load %arg9[%c0_25, %c0_26] : memref<1x128xf32, #tpu.memory_space<vmem>>, vector<1x128xf32>
      %cst_27 = arith.constant 7.812500e-03 : f32
      %38 = vector.broadcast %cst_27 : f32 to vector<1x128xf32>
      %39 = arith.mulf %37, %38 : vector<1x128xf32>
      %40 = arith.mulf %36, %36 : vector<1x128xf32>
      %41 = arith.subf %39, %40 : vector<1x128xf32>
      %cst_28 = arith.constant 0.000000e+00 : f32
      %42 = vector.broadcast %cst_28 : f32 to vector<1x128xf32>
      %43 = arith.maximumf %41, %42 : vector<1x128xf32>
      %c0_29 = arith.constant 0 : index
      %c0_30 = arith.constant 0 : index
      %44 = vector.load %arg4[%c0_29, %c0_30] : memref<1x128xf32, #tpu.memory_space<vmem>>, vector<1x128xf32>
      %cst_31 = arith.constant 9.99999974E-6 : f32
      %45 = vector.broadcast %cst_31 : f32 to vector<1x128xf32>
      %46 = arith.addf %43, %45 : vector<1x128xf32>
      %47 = math.rsqrt %46 : vector<1x128xf32>
      %48 = arith.mulf %44, %47 : vector<1x128xf32>
      %c0_32 = arith.constant 0 : index
      %c0_33 = arith.constant 0 : index
      %49 = vector.load %arg5[%c0_32, %c0_33] : memref<1x128xf32, #tpu.memory_space<vmem>>, vector<1x128xf32>
      %50 = arith.mulf %36, %48 : vector<1x128xf32>
      %51 = arith.subf %49, %50 : vector<1x128xf32>
      %52 = tpu.concatenate %48, %51 in 0 : vector<1x128xf32>, vector<1x128xf32> -> vector<2x128xf32>
      %c0_34 = arith.constant 0 : index
      %c0_35 = arith.constant 0 : index
      %53 = vector.load %arg7[%c0_34, %c0_35] : memref<2x128xf32, #tpu.memory_space<vmem>>, vector<2x128xf32>
      tpu.vector_store %arg7[%c0_34, %c0_35], %52 {strides = array<i32>} : memref<2x128xf32, #tpu.memory_space<vmem>>, vector<2x128xf32>,
    } else {
    }
    return
  }
  func.func @transform_0(%arg0: i32) -> (i32, i32) {
    %c0_i32 = arith.constant 0 : i32
    %c0_i32_0 = arith.constant 0 : i32
    return %arg0, %c0_i32 : i32, i32
  }
  func.func @transform_1(%arg0: i32) -> (i32, i32) {
    %c0_i32 = arith.constant 0 : i32
    %c0_i32_0 = arith.constant 0 : i32
    %c0_i32_1 = arith.constant 0 : i32
    return %c0_i32, %c0_i32_0 : i32, i32
  }
  func.func @transform_2(%arg0: i32) -> (i32, i32) {
    %c0_i32 = arith.constant 0 : i32
    %c0_i32_0 = arith.constant 0 : i32
    %c0_i32_1 = arith.constant 0 : i32
    return %c0_i32, %c0_i32_0 : i32, i32
  }
  func.func @transform_3(%arg0: i32) -> (i32, i32) {
    %c0_i32 = arith.constant 0 : i32
    %c0_i32_0 = arith.constant 0 : i32
    %c0_i32_1 = arith.constant 0 : i32
    return %c0_i32, %c0_i32_0 : i32, i32
  }
  func.func @transform_4(%arg0: i32) -> (i32, i32) {
    %c0_i32 = arith.constant 0 : i32
    %c0_i32_0 = arith.constant 0 : i32
    %c0_i32_1 = arith.constant 0 : i32
    return %c0_i32, %c0_i32_0 : i32, i32
  }
  func.func @transform_5(%arg0: i32) -> (i32, i32) {
    %c0_i32 = arith.constant 0 : i32
    %c0_i32_0 = arith.constant 0 : i32
    return %arg0, %c0_i32 : i32, i32
  }
  func.func @transform_6(%arg0: i32) -> (i32, i32) {
    %c0_i32 = arith.constant 0 : i32
    %c0_i32_0 = arith.constant 0 : i32
    %c0_i32_1 = arith.constant 0 : i32
    return %c0_i32, %c0_i32_0 : i32, i32
  }
}

</mosaic_0001>

<bundles_post_ra>
// kernel: tpu_custom_call.1
= control target key start
LH: loop header
LB: loop body
LE: loop exit
PB: predicated region body
PF: predicated region fallthrough
CT: control target
= control target key end

     0   :  { %12 = vsyncpa [#allocation5], 0  ;;  %vm106_vm0 = vcmask 1042432   ;;  %vm57_vm1 = vcmask 220160   ;;  %s786_s0 = inlined_call_operand.vmem [shape: f32[128,27], index: 0, kind: input, shape index: {}]   ;;  %s787_s1 = inlined_call_operand.vmem [shape: f32[27,128], index: 1, kind: input, shape index: {}]   ;;  %s788_s2 = inlined_call_operand.vmem [shape: f32[1,128], index: 2, kind: input, shape index: {}]   ;;  %s789_s3 = inlined_call_operand.vmem [shape: f32[1,128], index: 3, kind: input, shape index: {}]   ;;  %s790_s4 = inlined_call_operand.vmem [shape: f32[1,128], index: 4, kind: input, shape index: {}]   ;;  %s791_s5 = inlined_call_operand.hbm [shape: f32[128,128], index: 5, kind: output, shape index: {0}]   ;;  %s792_s6 = inlined_call_operand.hbm [shape: f32[2,128], index: 6, kind: output, shape index: {1}]  }
   0x1   :  { %v49_v0 = vld [vmem:[%s787_s1 + $0x18] sm:$0x7]  ;;  %v48_v1 = vld [vmem:[%s787_s1 + $0x10] sm:$0xff]  ;;  %v30_v2 = vld [vmem:[%s786_s0] sm:$0xff] }
   0x2   :  { %528 = vmatprep.subr.msk.mxu0 %vm106_vm0, %v49_v0  ;;  %560 = vmatprep.subr.msk.mxu1 %vm106_vm0, %v49_v0  ;;  %v47_v3 = vld [vmem:[%s787_s1 + $0x8] sm:$0xff]  ;;  %v46_v4 = vld [vmem:[%s787_s1] sm:$0xff] }
   0x3   :  { %529 = vmatpush3.msk.msra.mxu0 %vm106_vm0, %v49_v0  ;;  %536 = vmatprep.mubr.msk.f32.mxu0 %vm57_vm1, %v30_v2  ;;  %v31_v5 = vld [vmem:[%s786_s0 + $0x8] sm:$0xff] }
   0x4   :  { %530 = vmatprep.subr.mxu0 %v48_v1  ;;  %564 = vmatpush3.msk.msra.mxu1 %vm106_vm0, %v49_v0 }
   0x5   :  { %531 = vmatpush3.msra.mxu0 %v48_v1  ;;  %561 = vmatprep.subr.mxu1 %v48_v1 }
   0x6   :  { %532 = vmatprep.subr.mxu0 %v47_v3  ;;  %565 = vmatpush3.msra.mxu1 %v48_v1 }
   0x7   :  { %533 = vmatpush3.msra.mxu0 %v47_v3  ;;  %562 = vmatprep.subr.mxu1 %v47_v3 }
   0x8   :  { %13 = vsyncpa [#allocation7], 0  ;;  %534 = vmatprep.subr.mxu0 %v46_v4  ;;  %v32_v6 = vld [vmem:[%s786_s0 + $0x10] sm:$0xff]  ;;  %566 = vmatpush3.msra.mxu1 %v47_v3  ;;  %v38_v7 = vld [vmem:[%s786_s0 + $0x40] sm:$0xff]  ;;  %v619_v20 = vmov 0.0  }
   0x9   :  { %535 = vmatpush3.msra.mxu0 %v46_v4  ;;  %563 = vmatprep.subr.mxu1 %v46_v4  ;;  %v39_v8 = vld [vmem:[%s786_s0 + $0x48] sm:$0xff]  ;;  %v40_v9 = vld [vmem:[%s786_s0 + $0x50] sm:$0xff]  ;;  %v33_v10 = vld [vmem:[%s786_s0 + $0x18] sm:$0xff]  ;;  %28 = vst [vmem:[#allocation2] sm:$0x1] %v619_v20 }
   0xa   :  { %537 = vmatmul.mubr.msk.f32.vlgmr.msra.gmra.mxu0 %vm57_vm1, %v31_v5  ;;  %567 = vmatpush3.msra.mxu1 %v46_v4  ;;  %v34_v11 = vld [vmem:[%s786_s0 + $0x20] sm:$0xff]  ;;  %v41_v12 = vld [vmem:[%s786_s0 + $0x58] sm:$0xff]  ;;  %v35_v14 = vld [vmem:[%s786_s0 + $0x28] sm:$0xff]  ;;  %29 = vst [vmem:[#allocation3] sm:$0x1] %v619_v20 }
   0xb   :  { %539 = vmatprep.mubr.msk.f32.mxu0 %vm57_vm1, %v32_v6  ;;  %548 = vmatprep.mubr.msk.f32.mxu1 %vm57_vm1, %v38_v7  ;;  %v42_v13 = vld [vmem:[%s786_s0 + $0x60] sm:$0xff]  ;;  %v36_v15 = vld [vmem:[%s786_s0 + $0x30] sm:$0xff]  ;;  %v43_v16 = vld [vmem:[%s786_s0 + $0x68] sm:$0xff] }
   0xc   :  { %549 = vmatmul.mubr.msk.f32.vlgmr.msra.gmra.mxu1 %vm57_vm1, %v39_v8  ;;  %v44_v17 = vld [vmem:[%s786_s0 + $0x70] sm:$0xff]  ;;  %v37_v18 = vld [vmem:[%s786_s0 + $0x38] sm:$0xff]  ;;  %v738_v21 = vld [vmem:[%s788_s2] ss:$0 sm:$0xff] }
   0xd   :  { %551 = vmatprep.mubr.msk.f32.mxu1 %vm57_vm1, %v40_v9  ;;  %v45_v19 = vld [vmem:[%s786_s0 + $0x78] sm:$0xff]  ;;  %s620_s0 = smov [#allocation4]  }
   0xe   :  { %540 = vmatmul.mubr.msk.f32.gmra.mxu0 %vm57_vm1, %v33_v10  ;;  %s465_s2 = sshll.u32 %s620_s0, 4  ;;  %s466_s2 = int_to_ptr.vmem [resolvable:$true] %s465_s2 }
   0xf   :  { %542 = vmatprep.mubr.msk.f32.mxu0 %vm57_vm1, %v34_v11  ;;  %s575_s13 = scalar_lea.vmem %s466_s2, 2048  ;;  %p580_p1 = scmp.lt.s32.totalorder %s466_s2, %s466_s2 }
  0x10   :  { %552 = vmatmul.mubr.msk.f32.gmra.mxu1 %vm57_vm1, %v41_v12  ;;  %p576_p0 = scmp.ne.s32.totalorder %s466_s2, %s575_s13  ;;  %p581_p2 = scmp.lt.s32.totalorder %s575_s13, %s575_s13 }
  0x11   :  { %554 = vmatprep.mubr.msk.f32.mxu1 %vm57_vm1, %v42_v13 }
  0x12   :  { %543 = vmatmul.mubr.msk.f32.gmra.mxu0 %vm57_vm1, %v35_v14  ;;  %p582_p3 = por %p581_p2, %p580_p1 }
  0x13   :  { %545 = vmatprep.mubr.msk.f32.mxu0 %vm57_vm1, %v36_v15 }
  0x14   :  { %555 = vmatmul.mubr.msk.f32.gmra.mxu1 %vm57_vm1, %v43_v16  ;;  %p583_p4 = pnand %p582_p3, %p576_p0 }
  0x15   :  { %557 = vmatprep.mubr.msk.f32.mxu1 %vm57_vm1, %v44_v17 }
  0x16   :  { %546 = vmatmul.mubr.msk.f32.gmra.mxu0 %vm57_vm1, %v37_v18 }
  0x18   :  { %558 = vmatmul.mubr.msk.f32.gmra.mxu1 %vm57_vm1, %v45_v19 }
  0xca   :  { %v538_v22 = vpop.f32.mrf.mxu0 }
  0xcb   :  { %v182_v23 = vadd.f32 %v538_v22, %v738_v21 }
  0xcc   :  { %v176_v24 = vpop.f32.mrf.mxu0  ;;  %v550_v25 = vpop.f32.mrf.mxu1 }
  0xcd   :  { %256 = vst [vmem:[#allocation4 + $0x8] sm:$0xff] %v182_v23  ;;  %v177_v26 = vadd.f32 %v738_v21, %v176_v24  ;;  %v743_v27 = vadd.f32 %v550_v25, %v738_v21  ;;  %v396_v35 = vmul.f32 %v182_v23, %v182_v23 }
  0xce   :  { %v541_v28 = vpop.f32.mrf.mxu0  ;;  %v216_v29 = vpop.f32.mrf.mxu1 }
  0xcf   :  { %255 = vst [vmem:[#allocation4] sm:$0xff] %v177_v26  ;;  %v395_v30 = vmul.f32 %v177_v26, %v177_v26  ;;  %v192_v31 = vadd.f32 %v541_v28, %v738_v21  ;;  %264 = vst [vmem:[#allocation4 + $0x48] sm:$0xff] %v743_v27  ;;  %v748_v33 = vadd.f32 %v738_v21, %v216_v29 }
  0xd0   :  { %v186_v32 = vpop.f32.mrf.mxu0  ;;  %v553_v34 = vpop.f32.mrf.mxu1  ;;  %v371_v36 = vadd.f32 %v182_v23, %v177_v26 }
  0xd1   :  { %258 = vst [vmem:[#allocation4 + $0x18] sm:$0xff] %v192_v31  ;;  %v187_v37 = vadd.f32 %v738_v21, %v186_v32  ;;  %v752_v38 = vadd.f32 %v553_v34, %v738_v21  ;;  %263 = vst [vmem:[#allocation4 + $0x40] sm:$0xff] %v748_v33  ;;  %v411_v41 = vadd.f32 %v396_v35, %v395_v30 }
  0xd2   :  { %v544_v39 = vpop.f32.mrf.mxu0  ;;  %v226_v40 = vpop.f32.mrf.mxu1  ;;  %v398_v48 = vmul.f32 %v192_v31, %v192_v31 }
  0xd3   :  { %257 = vst [vmem:[#allocation4 + $0x10] sm:$0xff] %v187_v37  ;;  %v372_v42 = vadd.f32 %v371_v36, %v187_v37  ;;  %v397_v43 = vmul.f32 %v187_v37, %v187_v37  ;;  %v202_v44 = vadd.f32 %v544_v39, %v738_v21  ;;  %266 = vst [vmem:[#allocation4 + $0x58] sm:$0xff] %v752_v38 }
  0xd4   :  { %v196_v45 = vpop.f32.mrf.mxu0  ;;  %v227_v46 = vadd.f32 %v738_v21, %v226_v40  ;;  %v556_v47 = vpop.f32.mrf.mxu1 }
  0xd5   :  { %v412_v49 = vadd.f32 %v411_v41, %v397_v43  ;;  %260 = vst [vmem:[#allocation4 + $0x28] sm:$0xff] %v202_v44  ;;  %v197_v50 = vadd.f32 %v738_v21, %v196_v45  ;;  %v373_v51 = vadd.f32 %v372_v42, %v192_v31  ;;  %v242_v53 = vadd.f32 %v556_v47, %v738_v21 }
  0xd6   :  { %v547_v52 = vpop.f32.mrf.mxu0  ;;  %265 = vst [vmem:[#allocation4 + $0x50] sm:$0xff] %v227_v46  ;;  %v236_v54 = vpop.f32.mrf.mxu1  ;;  %v400_v62 = vmul.f32 %v202_v44, %v202_v44 }
  0xd7   :  { %259 = vst [vmem:[#allocation4 + $0x20] sm:$0xff] %v197_v50  ;;  %v374_v55 = vadd.f32 %v373_v51, %v197_v50  ;;  %v399_v56 = vmul.f32 %v197_v50, %v197_v50  ;;  %v413_v57 = vadd.f32 %v412_v49, %v398_v48  ;;  %v212_v58 = vadd.f32 %v547_v52, %v738_v21 }
  0xd8   :  { %v206_v59 = vpop.f32.mrf.mxu0  ;;  %268 = vst [vmem:[#allocation4 + $0x68] sm:$0xff] %v242_v53  ;;  %v237_v60 = vadd.f32 %v738_v21, %v236_v54  ;;  %v559_v61 = vpop.f32.mrf.mxu1 }
  0xd9   :  { %v414_v63 = vadd.f32 %v413_v57, %v399_v56  ;;  %262 = vst [vmem:[#allocation4 + $0x38] sm:$0xff] %v212_v58  ;;  %v207_v0 = vadd.f32 %v738_v21, %v206_v59  ;;  %v375_v1 = vadd.f32 %v374_v55, %v202_v44  ;;  %v252_v2 = vadd.f32 %v559_v61, %v738_v21 }
  0xda   :  { %267 = vst [vmem:[#allocation4 + $0x60] sm:$0xff] %v237_v60  ;;  %v246_v3 = vpop.f32.mrf.mxu1  ;;  %v402_v8 = vmul.f32 %v212_v58, %v212_v58 }
  0xdb   :  { %261 = vst [vmem:[#allocation4 + $0x30] sm:$0xff] %v207_v0  ;;  %v376_v4 = vadd.f32 %v375_v1, %v207_v0  ;;  %v401_v5 = vmul.f32 %v207_v0, %v207_v0  ;;  %v415_v6 = vadd.f32 %v414_v63, %v400_v62  ;;  %v247_v7 = vadd.f32 %v738_v21, %v246_v3 }
  0xdc   :  { %270 = vst [vmem:[#allocation4 + $0x78] sm:$0xff] %v252_v2 }
  0xdd   :  { %v416_v9 = vadd.f32 %v415_v6, %v401_v5  ;;  %v377_v10 = vadd.f32 %v376_v4, %v212_v58  ;;  %269 = vst [vmem:[#allocation4 + $0x70] sm:$0xff] %v247_v7 }
  0xde   :  { %586 = shalt.err (!%p583_p4)
}
  0xdf   :  { %s621_s14 = smov 128   ;;  %s622_s15 = smov 8   ;;  %v378_v11 = vadd.f32 %v377_v10, %v748_v33  ;;  %v403_v12 = vmul.f32 %v748_v33, %v748_v33  ;;  %v417_v13 = vadd.f32 %v416_v9, %v402_v8  ;;  %v404_v14 = vmul.f32 %v743_v27, %v743_v27  ;;  %v370_v45 = vld [vmem:[#allocation2] sm:$0x1]  ;;  %v394_v48 = vld [vmem:[#allocation3] sm:$0x1] }
  0xe0   :  { %471 = dma.vmem_to_hbm [thread:$0]  %s466_s2, 2048, %s791_s5, [#allocation5], %s621_s14, %s621_s14, %s622_s15   ;;  %v405_v18 = vmul.f32 %v227_v46, %v227_v46  ;;  %v406_v20 = vmul.f32 %v752_v38, %v752_v38  ;;  %v407_v24 = vmul.f32 %v237_v60, %v237_v60  ;;  %v408_v26 = vmul.f32 %v242_v53, %v242_v53 }
  0xe1   :  { %v418_v15 = vadd.f32 %v417_v13, %v403_v12  ;;  %v379_v16 = vadd.f32 %v378_v11, %v743_v27  ;;  %v409_v31 = vmul.f32 %v247_v7, %v247_v7  ;;  %v410_v33 = vmul.f32 %v252_v2, %v252_v2  ;;  %v444_v61 = vld [vmem:[%s789_s3] sm:$0x1]  ;;  %s623_s21 = smov [#allocation6]  }
  0xe2   :  { %v448_v1 = vld [vmem:[%s790_s4] sm:$0x1]  ;;  %s478_s22 = sshll.u32 %s623_s21, 4  ;;  %vm457_vm2 = vcmask 1040384   ;;  %s479_s22 = int_to_ptr.vmem [resolvable:$true] %s478_s22 }
  0xe3   :  { %v380_v17 = vadd.f32 %v379_v16, %v227_v46  ;;  %v419_v19 = vadd.f32 %v418_v15, %v404_v14  ;;  %s595_s23 = scalar_lea.vmem %s479_s22, 32  ;;  %p600_p6 = scmp.lt.s32.totalorder %s479_s22, %s479_s22 }
  0xe4   :  { %p596_p5 = scmp.ne.s32.totalorder %s479_s22, %s595_s23  ;;  %p601_p7 = scmp.lt.s32.totalorder %s595_s23, %s595_s23 }
  0xe5   :  { %v420_v21 = vadd.f32 %v419_v19, %v405_v18  ;;  %v381_v22 = vadd.f32 %v380_v17, %v752_v38 }
  0xe6   :  { %p602_p8 = por %p601_p7, %p600_p6 }
  0xe7   :  { %v382_v23 = vadd.f32 %v381_v22, %v237_v60  ;;  %v421_v25 = vadd.f32 %v420_v21, %v406_v20  ;;  %v452_v60 = vlaneseq }
  0xe8   :  { %p603_p9 = pnand %p602_p8, %p596_p5 }
  0xe9   :  { %v422_v28 = vadd.f32 %v421_v25, %v407_v24  ;;  %v383_v29 = vadd.f32 %v382_v23, %v242_v53  ;;  %v453_v62 = vshrl.u32 %v452_v60, 7 }
  0xeb   :  { %v384_v30 = vadd.f32 %v383_v29, %v247_v7  ;;  %v423_v32 = vadd.f32 %v422_v28, %v408_v26  ;;  %v454_v3 = vsub.s32 0, %v453_v62 }
  0xed   :  { %v385_v27 = vadd.f32 %v384_v30, %v252_v2  ;;  %v424_v34 = vadd.f32 %v423_v32, %v409_v31 }
  0xef   :  { %v386_v35 = vrot.slane %v385_v27, 4  ;;  %v425_v36 = vadd.f32 %v424_v34, %v410_v33 }
  0xf1   :  { %v387_v37 = vadd.f32 %v386_v35, %v385_v27  ;;  %v426_v39 = vrot.slane %v425_v36, 4 }
  0xf3   :  { %v388_v40 = vrot.slane %v387_v37, 2  ;;  %v427_v41 = vadd.f32 %v426_v39, %v425_v36 }
  0xf5   :  { %v389_v42 = vadd.f32 %v388_v40, %v387_v37  ;;  %v428_v38 = vrot.slane %v427_v41, 2 }
  0xf7   :  { %v390_v43 = vrot.slane %v389_v42, 1  ;;  %v429_v44 = vadd.f32 %v428_v38, %v427_v41 }
  0xf9   :  { %v391_v46 = vadd.f32 %v390_v43, %v389_v42  ;;  %v430_v47 = vrot.slane %v429_v44, 1 }
  0xfb   :  { %v392_v49 = vadd.f32 %v391_v46, %v370_v45  ;;  %v431_v50 = vadd.f32 %v430_v47, %v429_v44 }
  0xfd   :  { %393 = vst [vmem:[#allocation2] sm:$0x1] %v392_v49  ;;  %v432_v51 = vadd.f32 %v431_v50, %v394_v48 }
  0xff   :  { %433 = vst [vmem:[#allocation3] sm:$0x1] %v432_v51 }
 0x104   :  { %v437_v52 = vld [vmem:[#allocation2] sm:$0x1] }
 0x105   :  { %v438_v53 = vmul.f32 0.0078125, %v437_v52 }
 0x106   :  { %v439_v54 = vld [vmem:[#allocation3] sm:$0x1] }
 0x107   :  { %v440_v55 = vmul.f32 0.0078125, %v439_v54  ;;  %v441_v56 = vmul.f32 %v438_v53, %v438_v53 }
 0x109   :  { %v442_v57 = vsub.f32 %v440_v55, %v441_v56 }
 0x10b   :  { %v443_v58 = vmax.f32 %v442_v57, 0.0 }
 0x10d   :  { %v445_v59 = vadd.f32 1e-05, %v443_v58 }
 0x10f   :  { %573 = vrsqrt.f32 %v445_v59 }
 0x11c   :  { %v574_v63 = vpop.eup %573 }
 0x11d   :  { %v447_v0 = vmul.f32 %v574_v63, %v444_v61 }
 0x11f   :  { %v449_v2 = vmul.f32 %v447_v0, %v438_v53 }
 0x121   :  { %v450_v4 = vsub.f32 %v448_v1, %v449_v2 }
 0x123   :  { %v455_v5 = vrot.slane %v450_v4, %v454_v3 }
 0x125   :  { %v458_v6 = vsel %vm457_vm2, %v447_v0, %v455_v5 }
 0x126   :  { %459 = vst [vmem:[#allocation6] sm:$0x3] %v458_v6 }
 0x127   :  { %606 = shalt.err (!%p603_p9)
}
 0x128   :  { %481 = dma.vmem_to_hbm [thread:$0]  %s479_s22, 32, %s792_s6, [#allocation7]  }
 0x129   :  { %615 = dma.done.wait [#allocation5], 2048  }
 0x12a   :  { %616 = vsyncadd [#allocation5], 4294965248 }
 0x12b   :  { %617 = dma.done.wait [#allocation7], 32  }
 0x12c   :  { %618 = vsyncadd [#allocation7], 4294967264 }
 0x12d   :  { %488 = vsyncpa [#allocation5], 1 }
 0x12e   :  { %489 = vsyncpa [#allocation7], 1 }

</bundles_post_ra>
